<compile_context>
chip_gen: v5e
topology: v5e:2x2
jax: 0.10.0
libtpu: 0.0.40
codegen_flags: <defaults>
</compile_context>

<pallas_src>
import jax
import jax.numpy as jnp
from jax.experimental import pallas as pl
from jax.experimental.pallas import tpu as pltpu


def _round_up(x, m):
    return ((x + m - 1) // m) * m


def _cdiv(a, b):
    return -(-a // b)


def _pick_batch_block(n, block_b):
    """Balanced batch blocks: amortize per-step overhead, bound padding
    waste, and give the 'parallel' grid axis >= 2 steps for large batches so
    v7x's second TensorCore is not idle."""
    nb = max(1, _cdiv(n, block_b))
    if nb == 1 and n >= 256:
        nb = 2
    bblk = _round_up(_cdiv(n, nb), 16)   # 16-row multiple: bf16 sublane pack
    return bblk, nb


def bcn_forward_pallas(x_nchw, p, bn_eps=1e-5, block_b=1024):
    """Forward pass of `bcn` (eval mode) as one Pallas kernel."""
    N, C, D, D2 = x_nchw.shape
    assert C == 1 and D == D2
    f32, bf16 = jnp.float32, jnp.bfloat16

    F = p["w_e2e_row"].shape[0]          # e2e filters
    G = p["w_e2n_row"].shape[0]          # e2n filters
    H = p["w_n2g"].shape[0]              # n2g filters
    O = p["w_fc"].shape[0]               # output dim (1 or 2)

    DD = D * D
    WF, WG = D * F, D * G
    WFp = _round_up(WF, 128)
    WGp = _round_up(WG, 128)
    Op = _round_up(O, 128)
    Wmax = max(WGp, Op)

    # ---------------- one-time weight preprocessing (wrapper side, f32) -----
    eye = jnp.eye(D, dtype=f32)
    wer = p["w_e2e_row"].astype(f32)     # (F, D)   Conv2d(1, F, (1, D))
    wec = p["w_e2e_col"].astype(f32)     # (F, D)   Conv2d(1, F, (D, 1))
    wnr = p["w_e2n_row"].astype(f32)     # (G, F, D)
    wnc = p["w_e2n_col"].astype(f32)     # (G, F, D)
    wg = p["w_n2g"].astype(f32)          # (H, G, D)
    wfc = p["w_fc"].astype(f32)          # (O, H)

    # Edge2Edge as maps from flattened x[i*D+j] to row1[i*F+f] / col1[j*F+f].
    w1r = jnp.einsum("ik,fj->ijkf", eye, wer).reshape(DD, WF)
    w1c = jnp.einsum("jk,fi->ijkf", eye, wec).reshape(DD, WF)

    # Edge2Node, factorized through linearity of Y = row_ex + col_ex
    # (the (B, e2e, D, D) tensor Y is never materialized, no transposes):
    wrs = wnr.sum(axis=2).T              # (F, G)  sum_j Wr[g,f,j]
    wcs = wnc.sum(axis=2).T              # (F, G)  sum_i Wc[g,f,i]
    ar = (jnp.einsum("ik,fg->ifkg", eye, wrs)
          + jnp.transpose(wnc, (2, 1, 0))[:, :, None, :]).reshape(WF, WG)
    ac = (jnp.einsum("jk,fg->jfkg", eye, wcs)
          + jnp.transpose(wnr, (2, 1, 0))[:, :, None, :]).reshape(WF, WG)

    # Node2Graph (WG -> H) with BN(eval) scale folded into its columns, then
    # pre-multiplied with the FC layer into one (WG, O) matrix.
    w3 = jnp.transpose(wg, (2, 1, 0)).reshape(WG, H)
    bn_scale = p["bn_gamma"].astype(f32) / jnp.sqrt(
        p["bn_running_var"].astype(f32) + bn_eps)
    bn_shift = p["bn_beta"].astype(f32) - p["bn_running_mean"].astype(f32) * bn_scale
    wzo = (w3 * bn_scale[None, :]) @ wfc.T                       # (WG, O)

    # Fold ALL biases:
    #   * Edge2Edge row/col biases pass linearly through [ar ; ac],
    #   * Edge2Node biases tile over nodes,
    #   * Node2Graph bias + BN shift + FC bias collapse into the output bias.
    b1r = jnp.tile(p["b_e2e_row"].astype(f32), D)                # (WF,)
    b1c = jnp.tile(p["b_e2e_col"].astype(f32), D)                # (WF,)
    b2 = jnp.tile((p["b_e2n_row"] + p["b_e2n_col"]).astype(f32), D)   # (WG,)
    bz = b1r @ ar + b1c @ ac + b2                                # (WG,)
    bo = (p["b_n2g"].astype(f32) * bn_scale + bn_shift) @ wfc.T \
        + p["b_fc"].astype(f32)                                  # (O,)

    # Concatenate / pad to lane-dense bf16 matrices.
    w1 = jnp.zeros((DD, 2 * WFp), f32)
    w1 = w1.at[:, :WF].set(w1r).at[:, WFp:WFp + WF].set(w1c).astype(bf16)
    w2 = jnp.zeros((2 * WFp, WGp), f32)
    w2 = w2.at[:WF, :WG].set(ar).at[WFp:WFp + WF, :WG].set(ac).astype(bf16)
    wzo_p = jnp.zeros((WGp, Op), f32).at[:WG, :O].set(wzo).astype(bf16)

    biases = jnp.zeros((8, Wmax), f32)
    biases = biases.at[0, :WG].set(bz)
    biases = biases.at[1, :O].set(bo)

    # ---------------- batched, lane-dense input / output --------------------
    Bblk, nblk = _pick_batch_block(N, block_b)
    N_pad = Bblk * nblk
    xf = x_nchw[:, 0].reshape(N, DD).astype(bf16)
    if N_pad != N:
        xf = jnp.zeros((N_pad, DD), bf16).at[:N].set(xf)

    def kernel(xf_ref, w1_ref, w2_ref, wzo_ref, bias_ref, out_ref):
        xb = xf_ref[...]                                      # (B, D*D) bf16
        # Edge2Edge row+col line-convolutions (single fused matmul; E2E
        # biases folded downstream).  f32 accumulation on the MXU.
        h = jnp.dot(xb, w1_ref[...], preferred_element_type=jnp.float32)
        # TODO(synk): dropout is identity (eval mode).
        # Edge2Node, factorized (row/col correction terms fused into w2).
        z = jnp.dot(h.astype(jnp.bfloat16), w2_ref[...],
                    preferred_element_type=jnp.float32) + bias_ref[0:1, :WGp]
        # Node2Graph + BatchNorm(eval) + Linear, pre-fused into one matrix.
        out = jnp.dot(z.astype(jnp.bfloat16), wzo_ref[...],
                      preferred_element_type=jnp.float32) + bias_ref[1:2, :Op]
        out_ref[...] = out.astype(out_ref.dtype)              # lane-dense bf16

    flops = 2 * N_pad * (DD * 2 * WFp + 2 * WFp * WGp + WGp * Op)
    bytes_accessed = (xf.size * 2 + w1.size * 2 + w2.size * 2
                      + wzo_p.size * 2 + biases.size * 4 + N_pad * Op * 2)

    args = (xf, w1, w2, wzo_p, biases)
    in_specs = [pl.BlockSpec((Bblk, DD), lambda b: (b, 0))]
    # Constant operands: full-array blocks with constant index_map (no
    # per-step re-DMA).  TODO(synk): pipeline_mode=pl.Buffered(1) at
    # production sizes to halve their VMEM footprint.
    in_specs += [pl.BlockSpec(a.shape, lambda b: (0, 0)) for a in args[1:]]

    out = pl.pallas_call(
        kernel,
        out_shape=jax.ShapeDtypeStruct((N_pad, Op), bf16),
        grid=(nblk,),
        in_specs=in_specs,
        out_specs=pl.BlockSpec((Bblk, Op), lambda b: (b, 0)),
        compiler_params=pltpu.CompilerParams(
            dimension_semantics=("parallel",)),
        cost_estimate=pl.CostEstimate(flops=flops, transcendentals=0,
                                      bytes_accessed=bytes_accessed),
    )(*args)
    return out[:N, :O].astype(f32)


def bcn_forward_ref(x_nchw, p, bn_eps=1e-5):
    """Pure-JAX f32 reference mirroring the PyTorch module (eval mode)."""
    x = x_nchw[:, 0].astype(jnp.float32)
    row1 = jnp.einsum("nij,fj->nif", x, p["w_e2e_row"]) + p["b_e2e_row"]
    col1 = jnp.einsum("nij,fi->njf", x, p["w_e2e_col"]) + p["b_e2e_col"]
    Y = row1[:, :, None, :] + col1[:, None, :, :]        # (N, i, j, f)
    row2 = jnp.einsum("nijf,gfj->nig", Y, p["w_e2n_row"]) + p["b_e2n_row"]
    col2 = jnp.einsum("nijf,gfi->njg", Y, p["w_e2n_col"]) + p["b_e2n_col"]
    z = row2 + col2
    g = jnp.einsum("nig,hgi->nh", z, p["w_n2g"]) + p["b_n2g"]
    g = (g - p["bn_running_mean"]) / jnp.sqrt(p["bn_running_var"] + bn_eps) \
        * p["bn_gamma"] + p["bn_beta"]
    return g @ p["w_fc"].T + p["b_fc"]


def init_params(key, dim, e2e, e2n, n2g, out_dim):
    def xavier(k, shape, fan_in, fan_out):
        bound = (6.0 / (fan_in + fan_out)) ** 0.5
        return jax.random.uniform(k, shape, jnp.float32, -bound, bound)

    ks = jax.random.split(key, 12)
    p = {
        # Edge2Edge: Conv2d(1, e2e, (1, dim)) and Conv2d(1, e2e, (dim, 1))
        "w_e2e_row": xavier(ks[0], (e2e, dim), dim, e2e * dim),
        "w_e2e_col": xavier(ks[1], (e2e, dim), dim, e2e * dim),
        "b_e2e_row": jax.random.uniform(ks[2], (e2e,), jnp.float32, -0.1, 0.1),
        "b_e2e_col": jax.random.uniform(ks[3], (e2e,), jnp.float32, -0.1, 0.1),
        # Edge2Node: Conv2d(e2e, e2n, (1, dim)) and Conv2d(e2e, e2n, (dim, 1))
        "w_e2n_row": xavier(ks[4], (e2n, e2e, dim), e2e * dim, e2n * dim),
        "w_e2n_col": xavier(ks[5], (e2n, e2e, dim), e2e * dim, e2n * dim),
        "b_e2n_row": jax.random.uniform(ks[6], (e2n,), jnp.float32, -0.1, 0.1),
        "b_e2n_col": jax.random.uniform(ks[7], (e2n,), jnp.float32, -0.1, 0.1),
        # Node2Graph: Conv2d(e2n, n2g, (dim, 1))
        "w_n2g": xavier(ks[8], (n2g, e2n, dim), e2n * dim, n2g * dim),
        "b_n2g": jax.random.uniform(ks[9], (n2g,), jnp.float32, -0.1, 0.1),
        # BatchNorm1d(n2g): weight=1, bias=0, default running stats
        "bn_gamma": jnp.ones((n2g,), jnp.float32),
        "bn_beta": jnp.zeros((n2g,), jnp.float32),
        "bn_running_mean": jnp.zeros((n2g,), jnp.float32),
        "bn_running_var": jnp.ones((n2g,), jnp.float32),
        # Linear(n2g, out_dim)
        "w_fc": xavier(ks[10], (out_dim, n2g), n2g, out_dim),
        "b_fc": jax.random.uniform(ks[11], (out_dim,), jnp.float32, -0.1, 0.1),
    }
    return p


if __name__ == "__main__":
    N, dim = 2, 16
    e2e_f, e2n_f, n2g_f = 4, 8, 16
    out_dim = 1                                          # for_sex=False

    key = jax.random.PRNGKey(0)
    kx, kp = jax.random.split(key)
    x = jax.random.normal(kx, (N, 1, dim, dim), jnp.float32)   # NCHW, channel=1
    params = init_params(kp, dim, e2e_f, e2n_f, n2g_f, out_dim)

    out = jax.block_until_ready(bcn_forward_pallas(x, params))
    ref = bcn_forward_ref(x, params)

    assert out.shape == (N, out_dim), out.shape
    # bf16 operands + bf16 output store -> relaxed tolerance vs f32 reference.
    assert jnp.allclose(out, ref, atol=5e-2, rtol=5e-2), (out, ref)
    print("KERNEL_OK")
</pallas_src>

<mosaic_0001>
module attributes {stable_mosaic.version = 11 : i64} {
  func.func @kernel(%arg0: i32, %arg1: memref<16x256xbf16, #tpu.memory_space<vmem>>, %arg2: memref<256x256xbf16, #tpu.memory_space<vmem>>, %arg3: memref<256x128xbf16, #tpu.memory_space<vmem>>, %arg4: memref<128x128xbf16, #tpu.memory_space<vmem>>, %arg5: memref<8x128xf32, #tpu.memory_space<vmem>>, %arg6: memref<16x128xbf16, #tpu.memory_space<vmem>>) attributes {dimension_semantics = [#tpu.dimension_semantics<parallel>], iteration_bounds = array<i64: 1>, scalar_prefetch = 0 : i64, scratch_operands = 0 : i64, tpu.core_type = #tpu.core_type<tc>, window_params = [{transform_indices = @transform_0, window_bounds = array<i64: 16, 256>}, {pipeline_mode = #tpu.pipeline_mode<synchronous>, transform_indices = @transform_1, window_bounds = array<i64: 256, 256>}, {pipeline_mode = #tpu.pipeline_mode<synchronous>, transform_indices = @transform_2, window_bounds = array<i64: 256, 128>}, {pipeline_mode = #tpu.pipeline_mode<synchronous>, transform_indices = @transform_3, window_bounds = array<i64: 128, 128>}, {pipeline_mode = #tpu.pipeline_mode<synchronous>, transform_indices = @transform_4, window_bounds = array<i64: 8, 128>}, {transform_indices = @transform_5, window_bounds = array<i64: 16, 128>}]} {
    %c0 = arith.constant 0 : index
    %c0_0 = arith.constant 0 : index
    %0 = vector.load %arg1[%c0, %c0_0] : memref<16x256xbf16, #tpu.memory_space<vmem>>, vector<16x256xbf16>
    %c0_1 = arith.constant 0 : index
    %c0_2 = arith.constant 0 : index
    %1 = vector.load %arg2[%c0_1, %c0_2] : memref<256x256xbf16, #tpu.memory_space<vmem>>, vector<256x256xbf16>
    %cst = arith.constant dense<0.000000e+00> : vector<16x256xf32>
    %2 = tpu.matmul %0, %1, %cst {dimension_numbers = #tpu.dot_dimension_numbers<[1], [0], [0], [1], [0, 0, 1, 1], [], []>} : vector<16x256xbf16>, vector<256x256xbf16>, vector<16x256xf32> -> vector<16x256xf32>
    %3 = arith.truncf %2 : vector<16x256xf32> to vector<16x256xbf16>
    %c0_3 = arith.constant 0 : index
    %c0_4 = arith.constant 0 : index
    %4 = vector.load %arg3[%c0_3, %c0_4] : memref<256x128xbf16, #tpu.memory_space<vmem>>, vector<256x128xbf16>
    %cst_5 = arith.constant dense<0.000000e+00> : vector<16x128xf32>
    %5 = tpu.matmul %3, %4, %cst_5 {dimension_numbers = #tpu.dot_dimension_numbers<[1], [0], [0], [1], [0, 0, 1, 1], [], []>} : vector<16x256xbf16>, vector<256x128xbf16>, vector<16x128xf32> -> vector<16x128xf32>
    %c0_6 = arith.constant 0 : index
    %c0_7 = arith.constant 0 : index
    %6 = vector.load %arg5[%c0_6, %c0_7] : memref<8x128xf32, #tpu.memory_space<vmem>>, vector<1x128xf32>
    %7 = vector.broadcast %6 : vector<1x128xf32> to vector<16x128xf32>
    %8 = arith.addf %5, %7 : vector<16x128xf32>
    %9 = arith.truncf %8 : vector<16x128xf32> to vector<16x128xbf16>
    %c0_8 = arith.constant 0 : index
    %c0_9 = arith.constant 0 : index
    %10 = vector.load %arg4[%c0_8, %c0_9] : memref<128x128xbf16, #tpu.memory_space<vmem>>, vector<128x128xbf16>
    %cst_10 = arith.constant dense<0.000000e+00> : vector<16x128xf32>
    %11 = tpu.matmul %9, %10, %cst_10 {dimension_numbers = #tpu.dot_dimension_numbers<[1], [0], [0], [1], [0, 0, 1, 1], [], []>} : vector<16x128xbf16>, vector<128x128xbf16>, vector<16x128xf32> -> vector<16x128xf32>
    %c1 = arith.constant 1 : index
    %c0_11 = arith.constant 0 : index
    %12 = vector.load %arg5[%c1, %c0_11] : memref<8x128xf32, #tpu.memory_space<vmem>>, vector<1x128xf32>
    %13 = vector.broadcast %12 : vector<1x128xf32> to vector<16x128xf32>
    %14 = arith.addf %11, %13 : vector<16x128xf32>
    %15 = arith.truncf %14 : vector<16x128xf32> to vector<16x128xbf16>
    %c0_12 = arith.constant 0 : index
    %c0_13 = arith.constant 0 : index
    %16 = vector.load %arg6[%c0_12, %c0_13] : memref<16x128xbf16, #tpu.memory_space<vmem>>, vector<16x128xbf16>
    tpu.vector_store %arg6[%c0_12, %c0_13], %15 {strides = array<i32>} : memref<16x128xbf16, #tpu.memory_space<vmem>>, vector<16x128xbf16>,
    return
  }
  func.func @transform_0(%arg0: i32) -> (i32, i32) {
    %c0_i32 = arith.constant 0 : i32
    %c0_i32_0 = arith.constant 0 : i32
    return %arg0, %c0_i32 : i32, i32
  }
  func.func @transform_1(%arg0: i32) -> (i32, i32) {
    %c0_i32 = arith.constant 0 : i32
    %c0_i32_0 = arith.constant 0 : i32
    %c0_i32_1 = arith.constant 0 : i32
    return %c0_i32, %c0_i32_0 : i32, i32
  }
  func.func @transform_2(%arg0: i32) -> (i32, i32) {
    %c0_i32 = arith.constant 0 : i32
    %c0_i32_0 = arith.constant 0 : i32
    %c0_i32_1 = arith.constant 0 : i32
    return %c0_i32, %c0_i32_0 : i32, i32
  }
  func.func @transform_3(%arg0: i32) -> (i32, i32) {
    %c0_i32 = arith.constant 0 : i32
    %c0_i32_0 = arith.constant 0 : i32
    %c0_i32_1 = arith.constant 0 : i32
    return %c0_i32, %c0_i32_0 : i32, i32
  }
  func.func @transform_4(%arg0: i32) -> (i32, i32) {
    %c0_i32 = arith.constant 0 : i32
    %c0_i32_0 = arith.constant 0 : i32
    %c0_i32_1 = arith.constant 0 : i32
    return %c0_i32, %c0_i32_0 : i32, i32
  }
  func.func @transform_5(%arg0: i32) -> (i32, i32) {
    %c0_i32 = arith.constant 0 : i32
    %c0_i32_0 = arith.constant 0 : i32
    return %arg0, %c0_i32 : i32, i32
  }
}

</mosaic_0001>

<bundles_post_ra>
// kernel: tpu_custom_call.1
= control target key start
LH: loop header
LB: loop body
LE: loop exit
PB: predicated region body
PF: predicated region fallthrough
CT: control target
= control target key end

     0   :  { %10 = vsyncpa [#allocation3], 0  ;;  %s1149_s0 = inlined_call_operand.hbm [shape: bf16[16,256], index: 0, kind: input, shape index: {}]   ;;  %s1150_s1 = inlined_call_operand.hbm [shape: bf16[256,256], index: 1, kind: input, shape index: {}]   ;;  %s1151_s2 = inlined_call_operand.hbm [shape: bf16[256,128], index: 2, kind: input, shape index: {}]   ;;  %s1152_s3 = inlined_call_operand.hbm [shape: bf16[128,128], index: 3, kind: input, shape index: {}]   ;;  %s1153_s4 = inlined_call_operand.hbm [shape: f32[8,128], index: 4, kind: input, shape index: {}]   ;;  %s1154_s5 = inlined_call_operand.hbm [shape: bf16[16,128], index: 5, kind: output, shape index: {}]  }
   0x1   :  { %11 = vsyncpa [#allocation6], 0 }
   0x2   :  { %12 = vsyncpa [#allocation9], 0 }
   0x3   :  { %13 = vsyncpa [#allocation4], 0  ;;  %s31_s20 = sshll.u32 %s1150_s1, 4  ;;  %s1082_s21 = smov [#allocation5]   ;;  %s32_s20 = int_to_ptr.hbm [resolvable:$true] %s31_s20 }
   0x4   :  { %s33_s22 = sshll.u32 %s1082_s21, 4  ;;  %s1083_s23 = smov 128   ;;  %s34_s22 = int_to_ptr.vmem [resolvable:$true] %s33_s22 }
   0x5   :  { %s1084_s24 = smov 8   ;;  %s57_s27 = sshll.u32 %s1152_s3, 4  ;;  %s58_s27 = int_to_ptr.hbm [resolvable:$true] %s57_s27 }
   0x6   :  { %39 = dma.hbm_to_vmem [thread:$0]  %s32_s20, 4096, %s34_s22, [#allocation6], %s1083_s23, %s1083_s23, %s1084_s24  }
   0x7   :  { %s1085_s28 = smov [#allocation8]   ;;  %s18_s7 = sshll.u32 %s1149_s0, 4  ;;  %s19_s7 = int_to_ptr.hbm [resolvable:$true] %s18_s7 }
   0x8   :  { %s59_s29 = sshll.u32 %s1085_s28, 4  ;;  %s1086_s1 = smov 64   ;;  %s60_s29 = int_to_ptr.vmem [resolvable:$true] %s59_s29 }
   0x9   :  { %s1087_s8 = smov 4   ;;  %s44_s11 = sshll.u32 %s1151_s2, 4  ;;  %s45_s11 = int_to_ptr.hbm [resolvable:$true] %s44_s11 }
   0xa   :  { %65 = dma.hbm_to_vmem [thread:$0]  %s58_s27, 1024, %s60_s29, [#allocation9], %s1086_s1, %s1086_s1, %s1087_s8  }
   0xb   :  { %s1088_s3 = smov [#allocation2]   ;;  %s1089_s13 = smov [#allocation7]  }
   0xc   :  { %s20_s12 = sshll.u32 %s1088_s3, 4  ;;  %s46_s14 = sshll.u32 %s1089_s13, 4  ;;  %s21_s12 = int_to_ptr.vmem [resolvable:$true] %s20_s12  ;;  %s47_s14 = int_to_ptr.vmem [resolvable:$true] %s46_s14 }
   0xd   :  { %26 = dma.hbm_to_vmem [thread:$0]  %s19_s7, 256, %s21_s12, [#allocation3], %s1083_s23, %s1083_s23, %s1084_s24  }
   0xe   :  { %s71_s16 = sshll.u32 %s1153_s4, 4  ;;  %s1090_s17 = smov [#allocation10]   ;;  %s72_s16 = int_to_ptr.hbm [resolvable:$true] %s71_s16 }
   0xf   :  { %52 = dma.hbm_to_vmem [thread:$0]  %s45_s11, 2048, %s47_s14, [#allocation6], %s1086_s1, %s1086_s1, %s1087_s8  }
  0x10   :  { %s73_s18 = sshll.u32 %s1090_s17, 4  ;;  %s74_s18 = int_to_ptr.vmem [resolvable:$true] %s73_s18 }
  0x11   :  { %76 = dma.hbm_to_vmem [thread:$0]  %s72_s16, 128, %s74_s18, [#allocation9]  }
  0x12   :  { %1074 = dma.done.wait [#allocation3], 256  }
  0x13   :  { %1075 = vsyncadd [#allocation3], 4294967040 }
  0x14   :  { %1076 = dma.done.wait [#allocation6], 6144  }
  0x15   :  { %1077 = vsyncadd [#allocation6], 4294961152 }
  0x16   :  { %1078 = dma.done.wait [#allocation9], 1152  }
  0x17   :  { %1079 = vsyncadd [#allocation9], 4294966144  ;;  %v689_v0 = vld [vmem:[#allocation5 + $0x70] sm:$0xf]  ;;  %v872_v1 = vld [vmem:[#allocation5 + $0x74] sm:$0xf0] }
  0x18   :  { %v753_v2 = vld [vmem:[#allocation5 + $0xf0] sm:$0xf]  ;;  %v690_v3 = vor.u32 %v872_v1, %v689_v0  ;;  %v888_v4 = vld [vmem:[#allocation5 + $0xf4] sm:$0xf0]  ;;  %v871_v5 = vld [vmem:[#allocation5 + $0x74] sm:$0xf] }
  0x19   :  { %v691_v6 = vld [vmem:[#allocation5 + $0x78] sm:$0xf0]  ;;  %v754_v7 = vor.u32 %v888_v4, %v753_v2  ;;  %v887_v9 = vld [vmem:[#allocation5 + $0xf4] sm:$0xf]  ;;  %v681_v11 = vld [vmem:[#allocation5 + $0x60] sm:$0xf] }
  0x1a   :  { %v694_v8 = vor.u32 %v871_v5, %v691_v6  ;;  %v755_v10 = vld [vmem:[#allocation5 + $0xf8] sm:$0xf0]  ;;  %301 = vmatpush.bf16.msra.mxu0 %v690_v3  ;;  %v870_v13 = vld [vmem:[#allocation5 + $0x64] sm:$0xf0]  ;;  %v745_v14 = vld [vmem:[#allocation5 + $0xe0] sm:$0xf] }
  0x1b   :  { %v758_v12 = vor.u32 %v887_v9, %v755_v10  ;;  %v886_v15 = vld [vmem:[#allocation5 + $0xe4] sm:$0xf0]  ;;  %315 = vmatpush.bf16.msra.mxu1 %v754_v7  ;;  %v682_v16 = vor.u32 %v870_v13, %v681_v11  ;;  %v869_v18 = vld [vmem:[#allocation5 + $0x64] sm:$0xf]  ;;  %v683_v19 = vld [vmem:[#allocation5 + $0x68] sm:$0xf0] }
  0x1c   :  { %329 = vmatpush.bf16.msra.mxu2 %v694_v8  ;;  %v746_v17 = vor.u32 %v886_v15, %v745_v14  ;;  %v885_v20 = vld [vmem:[#allocation5 + $0xe4] sm:$0xf]  ;;  %v686_v21 = vor.u32 %v869_v18, %v683_v19  ;;  %v747_v22 = vld [vmem:[#allocation5 + $0xe8] sm:$0xf0]  ;;  %v673_v23 = vld [vmem:[#allocation5 + $0x50] sm:$0xf] }
  0x1d   :  { %343 = vmatpush.bf16.msra.mxu3 %v758_v12  ;;  %v868_v24 = vld [vmem:[#allocation5 + $0x54] sm:$0xf0]  ;;  %v750_v25 = vor.u32 %v885_v20, %v747_v22  ;;  %v737_v26 = vld [vmem:[#allocation5 + $0xd0] sm:$0xf]  ;;  %v867_v28 = vld [vmem:[#allocation5 + $0x54] sm:$0xf] }
  0x1e   :  { %v884_v27 = vld [vmem:[#allocation5 + $0xd4] sm:$0xf0]  ;;  %302 = vmatpush.bf16.msra.mxu0 %v682_v16  ;;  %v674_v29 = vor.u32 %v868_v24, %v673_v23  ;;  %v675_v30 = vld [vmem:[#allocation5 + $0x58] sm:$0xf0]  ;;  %v883_v31 = vld [vmem:[#allocation5 + $0xd4] sm:$0xf] }
  0x1f   :  { %v739_v32 = vld [vmem:[#allocation5 + $0xd8] sm:$0xf0]  ;;  %316 = vmatpush.bf16.msra.mxu1 %v746_v17  ;;  %v738_v33 = vor.u32 %v884_v27, %v737_v26  ;;  %v678_v34 = vor.u32 %v867_v28, %v675_v30  ;;  %v665_v35 = vld [vmem:[#allocation5 + $0x40] sm:$0xf]  ;;  %v866_v36 = vld [vmem:[#allocation5 + $0x44] sm:$0xf0] }
  0x20   :  { %330 = vmatpush.bf16.msra.mxu2 %v686_v21  ;;  %v729_v37 = vld [vmem:[#allocation5 + $0xc0] sm:$0xf]  ;;  %v742_v38 = vor.u32 %v883_v31, %v739_v32  ;;  %v882_v39 = vld [vmem:[#allocation5 + $0xc4] sm:$0xf0]  ;;  %v865_v40 = vld [vmem:[#allocation5 + $0x44] sm:$0xf]  ;;  %v666_v44 = vor.u32 %v866_v36, %v665_v35 }
  0x21   :  { %344 = vmatpush.bf16.msra.mxu3 %v750_v25  ;;  %v667_v41 = vld [vmem:[#allocation5 + $0x48] sm:$0xf0]  ;;  %v881_v42 = vld [vmem:[#allocation5 + $0xc4] sm:$0xf]  ;;  %v730_v45 = vor.u32 %v882_v39, %v729_v37  ;;  %v657_v47 = vld [vmem:[#allocation5 + $0x30] sm:$0xf] }
  0x22   :  { %v731_v43 = vld [vmem:[#allocation5 + $0xc8] sm:$0xf0]  ;;  %303 = vmatpush.bf16.msra.mxu0 %v674_v29  ;;  %v670_v46 = vor.u32 %v865_v40, %v667_v41  ;;  %v864_v48 = vld [vmem:[#allocation5 + $0x34] sm:$0xf0]  ;;  %v721_v49 = vld [vmem:[#allocation5 + $0xb0] sm:$0xf] }
  0x23   :  { %317 = vmatpush.bf16.msra.mxu1 %v738_v33  ;;  %v734_v50 = vor.u32 %v881_v42, %v731_v43  ;;  %v880_v51 = vld [vmem:[#allocation5 + $0xb4] sm:$0xf0]  ;;  %v863_v52 = vld [vmem:[#allocation5 + $0x34] sm:$0xf]  ;;  %v659_v53 = vld [vmem:[#allocation5 + $0x38] sm:$0xf0]  ;;  %v658_v56 = vor.u32 %v864_v48, %v657_v47 }
  0x24   :  { %331 = vmatpush.bf16.msra.mxu2 %v678_v34  ;;  %v879_v54 = vld [vmem:[#allocation5 + $0xb4] sm:$0xf]  ;;  %v723_v55 = vld [vmem:[#allocation5 + $0xb8] sm:$0xf0]  ;;  %v722_v57 = vor.u32 %v880_v51, %v721_v49  ;;  %v662_v58 = vor.u32 %v863_v52, %v659_v53  ;;  %v649_v59 = vld [vmem:[#allocation5 + $0x20] sm:$0xf] }
  0x25   :  { %345 = vmatpush.bf16.msra.mxu3 %v742_v38  ;;  %v862_v60 = vld [vmem:[#allocation5 + $0x24] sm:$0xf0]  ;;  %v713_v61 = vld [vmem:[#allocation5 + $0xa0] sm:$0xf]  ;;  %v726_v62 = vor.u32 %v879_v54, %v723_v55  ;;  %v861_v0 = vld [vmem:[#allocation5 + $0x24] sm:$0xf] }
  0x26   :  { %304 = vmatpush.bf16.msra.mxu0 %v666_v44  ;;  %v878_v63 = vld [vmem:[#allocation5 + $0xa4] sm:$0xf0]  ;;  %v651_v1 = vld [vmem:[#allocation5 + $0x28] sm:$0xf0]  ;;  %v877_v2 = vld [vmem:[#allocation5 + $0xa4] sm:$0xf]  ;;  %v650_v4 = vor.u32 %v862_v60, %v649_v59 }
  0x27   :  { %318 = vmatpush.bf16.msra.mxu1 %v730_v45  ;;  %v715_v3 = vld [vmem:[#allocation5 + $0xa8] sm:$0xf0]  ;;  %v714_v5 = vor.u32 %v878_v63, %v713_v61  ;;  %v654_v6 = vor.u32 %v861_v0, %v651_v1  ;;  %v641_v7 = vld [vmem:[#allocation5 + $0x10] sm:$0xf]  ;;  %v860_v8 = vld [vmem:[#allocation5 + $0x14] sm:$0xf0] }
  0x28   :  { %332 = vmatpush.bf16.msra.mxu2 %v670_v46  ;;  %v705_v9 = vld [vmem:[#allocation5 + $0x90] sm:$0xf]  ;;  %v718_v10 = vor.u32 %v877_v2, %v715_v3  ;;  %v876_v11 = vld [vmem:[#allocation5 + $0x94] sm:$0xf0]  ;;  %v859_v12 = vld [vmem:[#allocation5 + $0x14] sm:$0xf]  ;;  %v642_v16 = vor.u32 %v860_v8, %v641_v7 }
  0x29   :  { %346 = vmatpush.bf16.msra.mxu3 %v734_v50  ;;  %v643_v13 = vld [vmem:[#allocation5 + $0x18] sm:$0xf0]  ;;  %v875_v14 = vld [vmem:[#allocation5 + $0x94] sm:$0xf]  ;;  %v633_v17 = vld [vmem:[#allocation5] sm:$0xf]  ;;  %v706_v19 = vor.u32 %v876_v11, %v705_v9 }
  0x2a   :  { %305 = vmatpush.bf16.msra.mxu0 %v658_v56  ;;  %v707_v15 = vld [vmem:[#allocation5 + $0x98] sm:$0xf0]  ;;  %v858_v18 = vld [vmem:[#allocation5 + $0x4] sm:$0xf0]  ;;  %v646_v20 = vor.u32 %v859_v12, %v643_v13  ;;  %v697_v21 = vld [vmem:[#allocation5 + $0x80] sm:$0xf] }
  0x2b   :  { %319 = vmatpush.bf16.msra.mxu1 %v722_v57  ;;  %v874_v22 = vld [vmem:[#allocation5 + $0x84] sm:$0xf0]  ;;  %v857_v23 = vld [vmem:[#allocation5 + $0x4] sm:$0xf]  ;;  %v710_v24 = vor.u32 %v875_v14, %v707_v15  ;;  %v635_v25 = vld [vmem:[#allocation5 + $0x8] sm:$0xf0]  ;;  %v634_v28 = vor.u32 %v858_v18, %v633_v17 }
  0x2c   :  { %333 = vmatpush.bf16.msra.mxu2 %v662_v58  ;;  %v873_v26 = vld [vmem:[#allocation5 + $0x84] sm:$0xf]  ;;  %v699_v27 = vld [vmem:[#allocation5 + $0x88] sm:$0xf0]  ;;  %v625_v29 = vld [vmem:[#allocation2] sm:$0xf]  ;;  %v698_v31 = vor.u32 %v874_v22, %v697_v21  ;;  %v638_v32 = vor.u32 %v857_v23, %v635_v25 }
  0x2d   :  { %347 = vmatpush.bf16.msra.mxu3 %v726_v62  ;;  %v856_v30 = vld [vmem:[#allocation2 + $0x4] sm:$0xf0]  ;;  %v855_v33 = vld [vmem:[#allocation2 + $0x4] sm:$0xf]  ;;  %v627_v34 = vld [vmem:[#allocation2 + $0x8] sm:$0xf0]  ;;  %v702_v35 = vor.u32 %v873_v26, %v699_v27 }
  0x2e   :  { %306 = vmatpush.bf16.msra.mxu0 %v650_v4  ;;  %v896_v36 = vld [vmem:[#allocation7 + $0x38] sm:$0xff]  ;;  %v626_v37 = vor.u32 %v856_v30, %v625_v29  ;;  %v630_v39 = vor.u32 %v855_v33, %v627_v34  ;;  %v895_v40 = vld [vmem:[#allocation7 + $0x30] sm:$0xff]  ;;  %v894_v42 = vld [vmem:[#allocation7 + $0x28] sm:$0xff]  ;;  %s1091_s2 = smov [#allocation11]   ;;  %s608_s21 = sshll.u32 %s1154_s5, 4  ;;  %s609_s21 = int_to_ptr.hbm [resolvable:$true] %s608_s21 }
  0x2f   :  { %320 = vmatpush.bf16.msra.mxu1 %v714_v5  ;;  %v904_v38 = vld [vmem:[#allocation7 + $0x78] sm:$0xff]  ;;  %v903_v41 = vld [vmem:[#allocation7 + $0x70] sm:$0xff]  ;;  %v902_v43 = vld [vmem:[#allocation7 + $0x68] sm:$0xff]  ;;  %s606_s4 = sshll.u32 %s1091_s2, 4  ;;  %s607_s4 = int_to_ptr.vmem [resolvable:$true] %s606_s4 }
  0x30   :  { %334 = vmatpush.bf16.msra.mxu2 %v654_v6  ;;  %v893_v44 = vld [vmem:[#allocation7 + $0x20] sm:$0xff]  ;;  %v892_v45 = vld [vmem:[#allocation7 + $0x18] sm:$0xff]  ;;  %v891_v47 = vld [vmem:[#allocation7 + $0x10] sm:$0xff] }
  0x31   :  { %348 = vmatpush.bf16.msra.mxu3 %v718_v10  ;;  %v901_v46 = vld [vmem:[#allocation7 + $0x60] sm:$0xff]  ;;  %v900_v48 = vld [vmem:[#allocation7 + $0x58] sm:$0xff]  ;;  %v890_v49 = vld [vmem:[#allocation7 + $0x8] sm:$0xff] }
  0x32   :  { %307 = vmatpush.bf16.msra.mxu0 %v642_v16  ;;  %v899_v50 = vld [vmem:[#allocation7 + $0x50] sm:$0xff]  ;;  %v889_v51 = vld [vmem:[#allocation7] sm:$0xff]  ;;  %v898_v52 = vld [vmem:[#allocation7 + $0x48] sm:$0xff] }
  0x33   :  { %321 = vmatpush.bf16.msra.mxu1 %v706_v19  ;;  %v897_v53 = vld [vmem:[#allocation7 + $0x40] sm:$0xff]  ;;  %v912_v54 = vld [vmem:[#allocation8 + $0x38] sm:$0xff]  ;;  %v911_v55 = vld [vmem:[#allocation8 + $0x30] sm:$0xff] }
  0x34   :  { %335 = vmatpush.bf16.msra.mxu2 %v646_v20  ;;  %v910_v56 = vld [vmem:[#allocation8 + $0x28] sm:$0xff]  ;;  %v909_v7 = vld [vmem:[#allocation8 + $0x20] sm:$0xff]  ;;  %v908_v8 = vld [vmem:[#allocation8 + $0x18] sm:$0xff] }
  0x35   :  { %349 = vmatpush.bf16.msra.mxu3 %v710_v24  ;;  %v907_v9 = vld [vmem:[#allocation8 + $0x10] sm:$0xff]  ;;  %v906_v10 = vld [vmem:[#allocation8 + $0x8] sm:$0xff]  ;;  %v905_v11 = vld [vmem:[#allocation8] sm:$0xff] }
  0x36   :  { %308 = vmatpush.bf16.msra.mxu0 %v634_v28  ;;  %v928_v14 = vld [vmem:[#allocation10] ss:$0 sm:$0xff]  ;;  %v929_v23 = vld [vmem:[#allocation10 + $0x1] ss:$0 sm:$0xff] }
  0x37   :  { %322 = vmatpush.bf16.msra.mxu1 %v698_v31 }
  0x38   :  { %336 = vmatpush.bf16.msra.mxu2 %v638_v32 }
  0x39   :  { %350 = vmatpush.bf16.msra.mxu3 %v702_v35  ;;  %309 = vmatmul.bf16.vlgmr.msra.gmra.mxu0 %v626_v37 }
  0x3a   :  { %489 = vmatpush.bf16.msrb.mxu0 %v896_v36  ;;  %323 = vmatmul.bf16.vlgmr.msra.gmra.mxu1 %v630_v39 }
  0x3b   :  { %503 = vmatpush.bf16.msrb.mxu1 %v904_v38  ;;  %337 = vmatmul.bf16.vlgmr.msra.gmra.mxu2 %v626_v37 }
  0x3c   :  { %351 = vmatmul.bf16.vlgmr.msra.gmra.mxu3 %v630_v39  ;;  %584 = vmatpush.bf16.msrb.mxu2 %v912_v54 }
  0x3e   :  { %490 = vmatpush.bf16.msrb.mxu0 %v895_v40 }
  0x3f   :  { %504 = vmatpush.bf16.msrb.mxu1 %v903_v41 }
  0x40   :  { %585 = vmatpush.bf16.msrb.mxu2 %v911_v55 }
  0x42   :  { %491 = vmatpush.bf16.msrb.mxu0 %v894_v42 }
  0x43   :  { %505 = vmatpush.bf16.msrb.mxu1 %v902_v43 }
  0x44   :  { %586 = vmatpush.bf16.msrb.mxu2 %v910_v56 }
  0x46   :  { %492 = vmatpush.bf16.msrb.mxu0 %v893_v44 }
  0x47   :  { %506 = vmatpush.bf16.msrb.mxu1 %v901_v46 }
  0x48   :  { %587 = vmatpush.bf16.msrb.mxu2 %v909_v7 }
  0x4a   :  { %493 = vmatpush.bf16.msrb.mxu0 %v892_v45 }
  0x4b   :  { %507 = vmatpush.bf16.msrb.mxu1 %v900_v48 }
  0x4c   :  { %588 = vmatpush.bf16.msrb.mxu2 %v908_v8 }
  0x4e   :  { %494 = vmatpush.bf16.msrb.mxu0 %v891_v47 }
  0x4f   :  { %508 = vmatpush.bf16.msrb.mxu1 %v899_v50 }
  0x50   :  { %589 = vmatpush.bf16.msrb.mxu2 %v907_v9 }
  0x52   :  { %495 = vmatpush.bf16.msrb.mxu0 %v890_v49 }
  0x53   :  { %509 = vmatpush.bf16.msrb.mxu1 %v898_v52 }
  0x54   :  { %590 = vmatpush.bf16.msrb.mxu2 %v906_v10 }
  0x56   :  { %496 = vmatpush.bf16.msrb.mxu0 %v889_v51 }
  0x57   :  { %510 = vmatpush.bf16.msrb.mxu1 %v897_v53 }
  0x58   :  { %591 = vmatpush.bf16.msrb.mxu2 %v905_v11 }
  0xb6   :  { %v310_v57 = vpop.f32.mrf.mxu0 }
  0xb7   :  { %v324_v58 = vpop.f32.mrf.mxu1 }
  0xb8   :  { %v325_v63 = vadd.f32 %v324_v58, %v310_v57 }
  0xbe   :  { %v338_v59 = vpop.f32.mrf.mxu2  ;;  %v312_v61 = vpop.f32.mrf.mxu0 }
  0xbf   :  { %v352_v60 = vpop.f32.mrf.mxu3  ;;  %v326_v62 = vpop.f32.mrf.mxu1 }
  0xc0   :  { %v327_v0 = vadd.f32 %v326_v62, %v312_v61  ;;  %v353_v4 = vadd.f32 %v352_v60, %v338_v59 }
  0xc2   :  { %v357_v1 = vpack.c.bf16 %v327_v0, %v325_v63 }
  0xc4   :  { %497 = vmatmul.bf16.vlgmr.msrb.gmra.mxu0 %v357_v1 }
  0xc6   :  { %v340_v2 = vpop.f32.mrf.mxu2 }
  0xc7   :  { %v354_v3 = vpop.f32.mrf.mxu3 }
  0xc8   :  { %v355_v5 = vadd.f32 %v354_v3, %v340_v2 }
  0xca   :  { %v358_v6 = vpack.c.bf16 %v355_v5, %v353_v4 }
  0xcc   :  { %511 = vmatmul.bf16.vlgmr.msrb.gmra.mxu1 %v358_v6 }
 0x141   :  { %v498_v12 = vpop.f32.mrf.mxu0 }
 0x142   :  { %v499_v16 = vadd.f32 %v928_v14, %v498_v12 }
 0x149   :  { %v512_v13 = vpop.f32.mrf.mxu1  ;;  %v500_v15 = vpop.f32.mrf.mxu0 }
 0x14a   :  { %v501_v17 = vadd.f32 %v928_v14, %v500_v15  ;;  %v513_v19 = vadd.f32 %v512_v13, %v499_v16 }
 0x151   :  { %v514_v18 = vpop.f32.mrf.mxu1 }
 0x152   :  { %v515_v20 = vadd.f32 %v514_v18, %v501_v17 }
 0x154   :  { %v517_v21 = vpack.c.bf16 %v515_v20, %v513_v19 }
 0x156   :  { %592 = vmatmul.bf16.vlgmr.msrb.gmra.mxu2 %v517_v21 }
 0x1d9   :  { %v593_v22 = vpop.f32.mrf.mxu2 }
 0x1da   :  { %v594_v25 = vadd.f32 %v929_v23, %v593_v22 }
 0x1e1   :  { %v595_v24 = vpop.f32.mrf.mxu2 }
 0x1e2   :  { %v596_v26 = vadd.f32 %v929_v23, %v595_v24 }
 0x1e4   :  { %v916_v27 = vpack.c.bf16 %v596_v26, %v594_v25 }
 0x1e6   :  { %917 = vst [vmem:[#allocation11] sm:$0xff] %v916_v27  }
 0x1e7   :  { %614 = dma.vmem_to_hbm [thread:$0]  %s607_s4, 128, %s609_s21, [#allocation4], %s1086_s1, %s1086_s1, %s1087_s8  }
 0x1e8   :  { %1080 = dma.done.wait [#allocation4], 128  }
 0x1e9   :  { %1081 = vsyncadd [#allocation4], 4294967168 }
 0x1ea   :  { %619 = vsyncpa [#allocation3], 1 }
 0x1eb   :  { %620 = vsyncpa [#allocation6], 1 }
 0x1ec   :  { %621 = vsyncpa [#allocation9], 1 }
 0x1ed   :  { %622 = vsyncpa [#allocation4], 1 }

</bundles_post_ra>
